<compile_context>
chip_gen: v6e
topology: v6e:2x2x1
jax: 0.10.0
libtpu: 0.0.40
codegen_flags: <defaults>
</compile_context>

<pallas_src>
import functools

import jax
import jax.numpy as jnp
from jax import lax
from jax.experimental import pallas as pl
from jax.experimental.pallas import tpu as pltpu


def _round_up(x: int, m: int) -> int:
    return (x + m - 1) // m * m


def _projection_kernel(x_ref, w_ref, b_ref, alpha_ref, gamma_ref, beta_ref,
                       o_ref, acc_ref, *, eps: float, true_f_out: int,
                       mxu_dtype):
    k = pl.program_id(1)

    # Partial matmul for this K block (f32 accumulation on the MXU).
    x = x_ref[...]
    if mxu_dtype is not None:
        x = x.astype(mxu_dtype)
    partial = jnp.dot(x, w_ref[...], preferred_element_type=jnp.float32)

    @pl.when(k == 0)
    def _():
        acc_ref[...] = partial

    @pl.when(k > 0)
    def _():
        acc_ref[...] += partial

    # Epilogue (bias + PReLU + fused LayerNorm) only on the last K step.
    @pl.when(k == pl.num_programs(1) - 1)
    def _():
        y = acc_ref[...] + b_ref[...]            # bias already f32, (1, F_out_pad)

        # PReLU (single shared parameter, PyTorch default num_parameters=1).
        a = alpha_ref[0]                         # scalar load from SMEM
        y = jnp.where(y >= 0, y, a * y)

        # Fused LayerNorm statistics: one pass for s1=sum(y), s2=sum(y*y).
        # Padded columns are exactly zero, so dividing by the true F_out gives
        # the correct biased mean/variance over the real features.
        inv_n = jnp.float32(1.0 / true_f_out)
        s1 = jnp.sum(y, axis=-1, keepdims=True)
        s2 = jnp.sum(y * y, axis=-1, keepdims=True)
        mean = s1 * inv_n
        var = jnp.maximum(s2 * inv_n - mean * mean, 0.0)
        y_hat = (y - mean) * lax.rsqrt(var + eps)

        o_ref[...] = (y_hat * gamma_ref[...] + beta_ref[...]).astype(o_ref.dtype)


def projection_block(x, w, b, alpha, gamma, beta, *, eps=1e-5,
                     tile_rows=256, tile_k=None, mxu_dtype=jnp.bfloat16,
                     whole_k_max_bytes=(8 << 20)):
    """x: [..., F_in] -> [..., F_out].
       w: [F_in, F_out] (PyTorch linear.weight transposed), b: [F_out],
       alpha: scalar PReLU weight, gamma/beta: [F_out] LayerNorm params."""
    orig_shape = x.shape
    f_in = orig_shape[-1]
    f_out = w.shape[1]
    x2d = x.reshape(-1, f_in)
    n_rows = x2d.shape[0]
    out_dtype = x.dtype

    # Lane-dense output: pad the feature axis to a multiple of 128 with zeros.
    f_out_pad = _round_up(f_out, 128)
    col_pad = f_out_pad - f_out

    x_item = jnp.dtype(x2d.dtype).itemsize
    w_item = jnp.dtype(mxu_dtype if mxu_dtype is not None else w.dtype).itemsize
    o_item = jnp.dtype(out_dtype).itemsize

    # ---- K tiling: whole-K if the weight is small, otherwise 128-aligned. ----
    if tile_k is None:
        tk = f_in if f_in * f_out_pad * w_item <= whole_k_max_bytes else 512
    else:
        tk = int(tile_k)
    if tk >= f_in:
        tk = f_in                      # single K block; block == full array dim
    else:
        tk = max(128, _round_up(tk, 128))
    k_blocks = pl.cdiv(f_in, tk)
    f_in_pad = k_blocks * tk
    pad_k = f_in_pad - f_in

    # ---- Row tiling: multiple of 8 (f32 sublane), clamped to problem size. ----
    tr = max(8, _round_up(int(tile_rows), 8))
    tr = min(tr, _round_up(n_rows, 8))

    def vmem_estimate(rows):
        return (2 * rows * tk * x_item            # x tile (double buffered)
                + 2 * tk * f_out_pad * w_item     # w tile (double buffered)
                + 2 * rows * f_out_pad * o_item   # out tile (double buffered)
                + rows * f_out_pad * 4            # f32 accumulator scratch
                + 6 * rows * f_out_pad * 4        # epilogue temporaries
                + 8 * f_out_pad * 4               # bias/gamma/beta
                + (2 << 20))                      # headroom
    while tr > 64 and vmem_estimate(tr) > (48 << 20):
        tr = _round_up(tr // 2, 8)

    grid = (pl.cdiv(n_rows, tr), k_blocks)

    # ---- Parameter prep (all outside the kernel, traced once). ----
    w_p = w.astype(mxu_dtype) if mxu_dtype is not None else w
    b_p = b.astype(jnp.float32)
    g_p = gamma.astype(jnp.float32)
    bt_p = beta.astype(jnp.float32)
    if col_pad:
        w_p = jnp.pad(w_p, ((0, 0), (0, col_pad)))
        b_p = jnp.pad(b_p, ((0, col_pad),))
        g_p = jnp.pad(g_p, ((0, col_pad),))
        bt_p = jnp.pad(bt_p, ((0, col_pad),))
    if pad_k:
        # Zero K padding -> padded columns contribute exactly zero to the dot.
        w_p = jnp.pad(w_p, ((0, pad_k), (0, 0)))
        x2d = jnp.pad(x2d, ((0, 0), (0, pad_k)))
    b_p = b_p.reshape(1, f_out_pad)
    g_p = g_p.reshape(1, f_out_pad)
    bt_p = bt_p.reshape(1, f_out_pad)
    alpha_s = jnp.asarray(alpha, jnp.float32).reshape(1)     # SMEM scalar

    vmem_bytes = int(min(max(vmem_estimate(tr) + (4 << 20), 32 << 20), 64 << 20))

    w_refetch = grid[0] if k_blocks > 1 else 1
    cost = pl.CostEstimate(
        flops=2 * n_rows * f_in * f_out,
        transcendentals=n_rows,
        bytes_accessed=int(n_rows * f_in_pad * x_item
                           + w_refetch * f_in_pad * f_out_pad * w_item
                           + n_rows * f_out_pad * o_item
                           + 3 * f_out_pad * 4 + 4))

    out = pl.pallas_call(
        functools.partial(_projection_kernel, eps=float(eps),
                          true_f_out=f_out, mxu_dtype=mxu_dtype),
        out_shape=jax.ShapeDtypeStruct((n_rows, f_out_pad), out_dtype),
        grid_spec=pltpu.PrefetchScalarGridSpec(
            num_scalar_prefetch=0,
            grid=grid,
            in_specs=[
                pl.BlockSpec((tr, tk), lambda i, k: (i, k)),          # x tile
                pl.BlockSpec((tk, f_out_pad), lambda i, k: (k, 0)),   # W tile
                pl.BlockSpec((1, f_out_pad), lambda i, k: (0, 0)),    # bias (f32)
                pl.BlockSpec(memory_space=pltpu.MemorySpace.SMEM),    # PReLU alpha
                pl.BlockSpec((1, f_out_pad), lambda i, k: (0, 0)),    # LN gamma
                pl.BlockSpec((1, f_out_pad), lambda i, k: (0, 0)),    # LN beta
            ],
            out_specs=pl.BlockSpec((tr, f_out_pad), lambda i, k: (i, 0)),
            scratch_shapes=[pltpu.VMEM((tr, f_out_pad), jnp.float32)],
        ),
        compiler_params=pltpu.CompilerParams(
            dimension_semantics=("parallel", "arbitrary"),
            vmem_limit_bytes=vmem_bytes),
        cost_estimate=cost,
    )(x2d, w_p, b_p, alpha_s, g_p, bt_p)

    if col_pad:
        out = out[:, :f_out]
    return out.reshape(orig_shape[:-1] + (f_out,))


def init_params(key, in_features, out_features):
    """Deterministic init mirroring PyTorch defaults (shapes only)."""
    k_w, k_b = jax.random.split(key)
    bound = 1.0 / jnp.sqrt(jnp.float32(in_features))
    # PyTorch stores weight as [out, in]; we keep the transpose [in, out].
    w = jax.random.uniform(k_w, (in_features, out_features), jnp.float32,
                           minval=-bound, maxval=bound)
    b = jax.random.uniform(k_b, (out_features,), jnp.float32,
                           minval=-bound, maxval=bound)
    alpha = jnp.float32(0.25)                        # nn.PReLU default init
    gamma = jnp.ones((out_features,), jnp.float32)   # LayerNorm weight
    beta = jnp.zeros((out_features,), jnp.float32)   # LayerNorm bias
    return w, b, alpha, gamma, beta


def _reference(x, w, b, alpha, gamma, beta, eps=1e-5, mxu_dtype=None):
    if mxu_dtype is not None:
        y = jnp.dot(x.astype(mxu_dtype), w.astype(mxu_dtype),
                    preferred_element_type=jnp.float32)
    else:
        y = jnp.dot(x, w)
    y = y + b
    y = jnp.where(y >= 0, y, alpha * y)
    mean = jnp.mean(y, axis=-1, keepdims=True)
    var = jnp.mean((y - mean) ** 2, axis=-1, keepdims=True)
    return (y - mean) / jnp.sqrt(var + eps) * gamma + beta


def _check(out, x, w, b, alpha, gamma, beta, tag):
    ref_matched = _reference(x, w, b, alpha, gamma, beta, mxu_dtype=jnp.bfloat16)
    assert jnp.allclose(out, ref_matched, atol=2e-4, rtol=2e-4), \
        f"[{tag}] mismatch vs bf16-matmul reference"
    ref_f32 = _reference(x, w, b, alpha, gamma, beta)
    assert jnp.allclose(out, ref_f32, atol=5e-2, rtol=5e-2), \
        f"[{tag}] mismatch vs f32 reference"


if __name__ == "__main__":
    key = jax.random.PRNGKey(0)
    k_x1, k_p1, k_x2, k_p2 = jax.random.split(key, 4)

    # --- Test 1: small shapes, whole-K path (single K block). ---
    batch, seq = 2, 8
    in_features, out_features = 32, 32
    x = jax.random.normal(k_x1, (batch, seq, in_features), jnp.float32)
    w, b, alpha, gamma, beta = init_params(k_p1, in_features, out_features)
    out = jax.block_until_ready(projection_block(x, w, b, alpha, gamma, beta))
    assert out.shape == (batch, seq, out_features)
    _check(out, x, w, b, alpha, gamma, beta, "whole-K")

    # --- Test 2: exercises K-split (tile_k=128, padded K), ragged row tile
    #             and padded output columns. ---
    batch2, seq2 = 2, 5
    in2, out2 = 320, 192
    x2 = jax.random.normal(k_x2, (batch2, seq2, in2), jnp.float32)
    w2, b2, a2, g2, bt2 = init_params(k_p2, in2, out2)
    out_2 = jax.block_until_ready(
        projection_block(x2, w2, b2, a2, g2, bt2, tile_k=128))
    assert out_2.shape == (batch2, seq2, out2)
    _check(out_2, x2, w2, b2, a2, g2, bt2, "K-split")

    print("KERNEL_OK")
</pallas_src>

<mosaic_0001>
module attributes {stable_mosaic.version = 11 : i64} {
  func.func @_projection_kernel(%arg0: i32, %arg1: i32, %arg2: memref<16x32xf32, #tpu.memory_space<vmem>>, %arg3: memref<32x128xbf16, #tpu.memory_space<vmem>>, %arg4: memref<1x128xf32, #tpu.memory_space<vmem>>, %arg5: memref<1xf32, #tpu.memory_space<smem>>, %arg6: memref<1x128xf32, #tpu.memory_space<vmem>>, %arg7: memref<1x128xf32, #tpu.memory_space<vmem>>, %arg8: memref<16x128xf32, #tpu.memory_space<vmem>>, %arg9: memref<16x128xf32, #tpu.memory_space<vmem>>) attributes {dimension_semantics = [#tpu.dimension_semantics<parallel>, #tpu.dimension_semantics<arbitrary>], iteration_bounds = array<i64: 1, 1>, scalar_prefetch = 0 : i64, scratch_operands = 1 : i64, tpu.core_type = #tpu.core_type<tc>, window_params = [{transform_indices = @transform_0, window_bounds = array<i64: 16, 32>}, {transform_indices = @transform_1, window_bounds = array<i64: 32, 128>}, {pipeline_mode = #tpu.pipeline_mode<synchronous>, transform_indices = @transform_2, window_bounds = array<i64: 1, 128>}, {transform_indices = @transform_3, window_bounds = array<i64: 1>}, {pipeline_mode = #tpu.pipeline_mode<synchronous>, transform_indices = @transform_4, window_bounds = array<i64: 1, 128>}, {pipeline_mode = #tpu.pipeline_mode<synchronous>, transform_indices = @transform_5, window_bounds = array<i64: 1, 128>}, {transform_indices = @transform_6, window_bounds = array<i64: 16, 128>}]} {
    %c0 = arith.constant 0 : index
    %c0_0 = arith.constant 0 : index
    %0 = vector.load %arg2[%c0, %c0_0] : memref<16x32xf32, #tpu.memory_space<vmem>>, vector<16x32xf32>
    %1 = arith.truncf %0 : vector<16x32xf32> to vector<16x32xbf16>
    %c0_1 = arith.constant 0 : index
    %c0_2 = arith.constant 0 : index
    %2 = vector.load %arg3[%c0_1, %c0_2] : memref<32x128xbf16, #tpu.memory_space<vmem>>, vector<32x128xbf16>
    %cst = arith.constant dense<0.000000e+00> : vector<16x128xf32>
    %3 = tpu.matmul %1, %2, %cst {dimension_numbers = #tpu.dot_dimension_numbers<[1], [0], [0], [1], [0, 0, 1, 1], [], []>} : vector<16x32xbf16>, vector<32x128xbf16>, vector<16x128xf32> -> vector<16x128xf32>
    %c0_i32 = arith.constant 0 : i32
    %4 = arith.cmpi eq, %arg1, %c0_i32 : i32
    %5 = arith.extui %4 : i1 to i32
    %c0_i32_3 = arith.constant 0 : i32
    %6 = arith.cmpi ne, %5, %c0_i32_3 : i32
    scf.if %6 {
      %c0_8 = arith.constant 0 : index
      %c0_9 = arith.constant 0 : index
      %13 = vector.load %arg9[%c0_8, %c0_9] : memref<16x128xf32, #tpu.memory_space<vmem>>, vector<16x128xf32>
      tpu.vector_store %arg9[%c0_8, %c0_9], %3 {strides = array<i32>} : memref<16x128xf32, #tpu.memory_space<vmem>>, vector<16x128xf32>,
    } else {
    }
    %c0_i32_4 = arith.constant 0 : i32
    %7 = arith.cmpi sgt, %arg1, %c0_i32_4 : i32
    %8 = arith.extui %7 : i1 to i32
    %c0_i32_5 = arith.constant 0 : i32
    %9 = arith.cmpi ne, %8, %c0_i32_5 : i32
    scf.if %9 {
      %c0_8 = arith.constant 0 : index
      %c0_9 = arith.constant 0 : index
      %13 = vector.load %arg9[%c0_8, %c0_9] : memref<16x128xf32, #tpu.memory_space<vmem>>, vector<16x128xf32>
      %14 = arith.addf %13, %3 : vector<16x128xf32>
      %c0_10 = arith.constant 0 : index
      %c0_11 = arith.constant 0 : index
      %15 = vector.load %arg9[%c0_10, %c0_11] : memref<16x128xf32, #tpu.memory_space<vmem>>, vector<16x128xf32>
      tpu.vector_store %arg9[%c0_10, %c0_11], %14 {strides = array<i32>} : memref<16x128xf32, #tpu.memory_space<vmem>>, vector<16x128xf32>,
    } else {
    }
    %c0_i32_6 = arith.constant 0 : i32
    %10 = arith.cmpi eq, %arg1, %c0_i32_6 : i32
    %11 = arith.extui %10 : i1 to i32
    %c0_i32_7 = arith.constant 0 : i32
    %12 = arith.cmpi ne, %11, %c0_i32_7 : i32
    scf.if %12 {
      %c0_8 = arith.constant 0 : index
      %c0_9 = arith.constant 0 : index
      %13 = vector.load %arg9[%c0_8, %c0_9] : memref<16x128xf32, #tpu.memory_space<vmem>>, vector<16x128xf32>
      %c0_10 = arith.constant 0 : index
      %c0_11 = arith.constant 0 : index
      %14 = vector.load %arg4[%c0_10, %c0_11] : memref<1x128xf32, #tpu.memory_space<vmem>>, vector<1x128xf32>
      %15 = vector.broadcast %14 : vector<1x128xf32> to vector<16x128xf32>
      %16 = arith.addf %13, %15 : vector<16x128xf32>
      %c0_12 = arith.constant 0 : index
      %17 = memref.load %arg5[%c0_12] : memref<1xf32, #tpu.memory_space<smem>>
      %cst_13 = arith.constant 0.000000e+00 : f32
      %18 = vector.broadcast %cst_13 : f32 to vector<16x128xf32>
      %19 = arith.cmpf oge, %16, %18 : vector<16x128xf32>
      %20 = vector.broadcast %17 : f32 to vector<16x128xf32>
      %21 = arith.mulf %20, %16 : vector<16x128xf32>
      %22 = arith.select %19, %16, %21 : vector<16x128xi1>, vector<16x128xf32>
      %cst_14 = arith.constant dense<0.000000e+00> : vector<16xf32>
      %23 = vector.multi_reduction <add>, %22, %cst_14 [1] : vector<16x128xf32> to vector<16xf32>
      %24 = vector.shape_cast %23 : vector<16xf32> to vector<16x1xf32>
      %25 = arith.mulf %22, %22 : vector<16x128xf32>
      %cst_15 = arith.constant dense<0.000000e+00> : vector<16xf32>
      %26 = vector.multi_reduction <add>, %25, %cst_15 [1] : vector<16x128xf32> to vector<16xf32>
      %27 = vector.shape_cast %26 : vector<16xf32> to vector<16x1xf32>
      %cst_16 = arith.constant 3.125000e-02 : f32
      %28 = vector.broadcast %cst_16 : f32 to vector<16x1xf32>
      %29 = arith.mulf %24, %28 : vector<16x1xf32>
      %cst_17 = arith.constant 3.125000e-02 : f32
      %30 = vector.broadcast %cst_17 : f32 to vector<16x1xf32>
      %31 = arith.mulf %27, %30 : vector<16x1xf32>
      %32 = arith.mulf %29, %29 : vector<16x1xf32>
      %33 = arith.subf %31, %32 : vector<16x1xf32>
      %cst_18 = arith.constant 0.000000e+00 : f32
      %34 = vector.broadcast %cst_18 : f32 to vector<16x1xf32>
      %35 = arith.maximumf %33, %34 : vector<16x1xf32>
      %36 = vector.broadcast %29 : vector<16x1xf32> to vector<16x128xf32>
      %37 = arith.subf %22, %36 : vector<16x128xf32>
      %cst_19 = arith.constant 9.99999974E-6 : f32
      %38 = vector.broadcast %cst_19 : f32 to vector<16x1xf32>
      %39 = arith.addf %35, %38 : vector<16x1xf32>
      %40 = math.rsqrt %39 : vector<16x1xf32>
      %41 = vector.broadcast %40 : vector<16x1xf32> to vector<16x128xf32>
      %42 = arith.mulf %37, %41 : vector<16x128xf32>
      %c0_20 = arith.constant 0 : index
      %c0_21 = arith.constant 0 : index
      %43 = vector.load %arg6[%c0_20, %c0_21] : memref<1x128xf32, #tpu.memory_space<vmem>>, vector<1x128xf32>
      %44 = vector.broadcast %43 : vector<1x128xf32> to vector<16x128xf32>
      %45 = arith.mulf %42, %44 : vector<16x128xf32>
      %c0_22 = arith.constant 0 : index
      %c0_23 = arith.constant 0 : index
      %46 = vector.load %arg7[%c0_22, %c0_23] : memref<1x128xf32, #tpu.memory_space<vmem>>, vector<1x128xf32>
      %47 = vector.broadcast %46 : vector<1x128xf32> to vector<16x128xf32>
      %48 = arith.addf %45, %47 : vector<16x128xf32>
      %c0_24 = arith.constant 0 : index
      %c0_25 = arith.constant 0 : index
      %49 = vector.load %arg8[%c0_24, %c0_25] : memref<16x128xf32, #tpu.memory_space<vmem>>, vector<16x128xf32>
      tpu.vector_store %arg8[%c0_24, %c0_25], %48 {strides = array<i32>} : memref<16x128xf32, #tpu.memory_space<vmem>>, vector<16x128xf32>,
    } else {
    }
    return
  }
  func.func @transform_0(%arg0: i32, %arg1: i32) -> (i32, i32) {
    %c0_i32 = arith.constant 0 : i32
    return %arg0, %arg1 : i32, i32
  }
  func.func @transform_1(%arg0: i32, %arg1: i32) -> (i32, i32) {
    %c0_i32 = arith.constant 0 : i32
    %c0_i32_0 = arith.constant 0 : i32
    return %arg1, %c0_i32 : i32, i32
  }
  func.func @transform_2(%arg0: i32, %arg1: i32) -> (i32, i32) {
    %c0_i32 = arith.constant 0 : i32
    %c0_i32_0 = arith.constant 0 : i32
    %c0_i32_1 = arith.constant 0 : i32
    return %c0_i32, %c0_i32_0 : i32, i32
  }
  func.func @transform_3(%arg0: i32, %arg1: i32) -> i32 {
    %c0_i32 = arith.constant 0 : i32
    %c0_i32_0 = arith.constant 0 : i32
    return %c0_i32 : i32
  }
  func.func @transform_4(%arg0: i32, %arg1: i32) -> (i32, i32) {
    %c0_i32 = arith.constant 0 : i32
    %c0_i32_0 = arith.constant 0 : i32
    %c0_i32_1 = arith.constant 0 : i32
    return %c0_i32, %c0_i32_0 : i32, i32
  }
  func.func @transform_5(%arg0: i32, %arg1: i32) -> (i32, i32) {
    %c0_i32 = arith.constant 0 : i32
    %c0_i32_0 = arith.constant 0 : i32
    %c0_i32_1 = arith.constant 0 : i32
    return %c0_i32, %c0_i32_0 : i32, i32
  }
  func.func @transform_6(%arg0: i32, %arg1: i32) -> (i32, i32) {
    %c0_i32 = arith.constant 0 : i32
    %c0_i32_0 = arith.constant 0 : i32
    return %arg0, %c0_i32 : i32, i32
  }
}

</mosaic_0001>

<bundles_post_ra>
// kernel: tpu_custom_call.1
= control target key start
LH: loop header
LB: loop body
LE: loop exit
PB: predicated region body
PF: predicated region fallthrough
CT: control target
= control target key end

     0   :  { %12 = vsyncpa [#allocation5], 0  ;;  %s391_s0 = inlined_call_operand.hbm [shape: f32[16,32], index: 0, kind: input, shape index: {}]   ;;  %s392_s1 = inlined_call_operand.hbm [shape: bf16[32,128], index: 1, kind: input, shape index: {}]   ;;  %s393_s2 = inlined_call_operand.vmem [shape: f32[1,128], index: 2, kind: input, shape index: {}]   ;;  %s394_s3 = inlined_call_operand.<no memory space> [shape: f32[1], index: 3, kind: input, shape index: {}]   ;;  %s395_s4 = inlined_call_operand.vmem [shape: f32[1,128], index: 4, kind: input, shape index: {}]   ;;  %s396_s5 = inlined_call_operand.vmem [shape: f32[1,128], index: 5, kind: input, shape index: {}]   ;;  %s397_s6 = inlined_call_operand.hbm [shape: f32[16,128], index: 6, kind: output, shape index: {}]  }
   0x1   :  { %13 = vsyncpa [#allocation8], 0 }
   0x2   :  { %14 = vsyncpa [#allocation6], 0  ;;  %s320_s21 = smov [#allocation4]  }
   0x3   :  { %s20_s22 = sshll.u32 %s320_s21, 4  ;;  %s21_s22 = int_to_ptr.vmem [resolvable:$true] %s20_s22 }
   0x4   :  { %s262_s23 = scalar_lea.vmem %s21_s22, 256  ;;  %p267_p1 = scmp.lt.s32.totalorder %s21_s22, %s21_s22 }
   0x5   :  { %p263_p0 = scmp.ne.s32.totalorder %s21_s22, %s262_s23  ;;  %p268_p2 = scmp.lt.s32.totalorder %s262_s23, %s262_s23 }
   0x7   :  { %p269_p3 = por %p268_p2, %p267_p1 }
   0x9   :  { %p270_p4 = pnand %p269_p3, %p263_p0 }
   0xb   :  { %273 = shalt.err (!%p270_p4)
}
   0xc   :  { %s321_s24 = smov 128   ;;  %s322_s25 = smov 8  }
   0xd   :  { %26 = dma.hbm_to_vmem [thread:$0]  %s391_s0, 256, %s21_s22, [#allocation5], %s321_s24, %s321_s24, %s322_s25  }
   0xe   :  { %s323_s28 = smov [#allocation7]  }
   0xf   :  { %s32_s29 = sshll.u32 %s323_s28, 4  ;;  %s33_s29 = int_to_ptr.vmem [resolvable:$true] %s32_s29 }
  0x10   :  { %s282_s30 = scalar_lea.vmem %s33_s29, 256  ;;  %p287_p6 = scmp.lt.s32.totalorder %s33_s29, %s33_s29 }
  0x11   :  { %p283_p5 = scmp.ne.s32.totalorder %s33_s29, %s282_s30  ;;  %p288_p7 = scmp.lt.s32.totalorder %s282_s30, %s282_s30 }
  0x13   :  { %p289_p8 = por %p288_p7, %p287_p6 }
  0x15   :  { %p290_p9 = pnand %p289_p8, %p283_p5 }
  0x17   :  { %293 = shalt.err (!%p290_p9)
}
  0x18   :  { %s324_s7 = smov 64   ;;  %s325_s8 = smov 4  }
  0x19   :  { %38 = dma.hbm_to_vmem [thread:$0]  %s392_s1, 256, %s33_s29, [#allocation8], %s324_s7, %s324_s7, %s325_s8  }
  0x1a   :  { %314 = dma.done.wait [#allocation5], 256  }
  0x1b   :  { %315 = vsyncadd [#allocation5], 4294967040 }
  0x1c   :  { %316 = dma.done.wait [#allocation8], 256  }
  0x1d   :  { %317 = vsyncadd [#allocation8], 4294967040  ;;  %v326_v0 = vmov 0.0   ;;  %vm327_vm0 = vmmov 0   ;;  %v248_v1 = vld [vmem:[#allocation7 + $0x8] sm:$0xff]   ;;  %v249_v2 = vld [vmem:[#allocation7] sm:$0xff]   ;;  %v151_v8 = vstv %s394_s3 }
  0x1e   :  { %231 = vmatprep.subr.bf16.mxu0 %v326_v0  ;;  %235 = vmatprep.mubr.msk.bf16.mxu0 %vm327_vm0, %v326_v0  ;;  %v54_v3 = vld [vmem:[#allocation4] sm:$0xff]  ;;  %v55_v4 = vld [vmem:[#allocation4 + $0x8] sm:$0xff]  ;;  %vm73_vm1 = vcmask 261120   ;;  %s328_s15 = smov [#allocation9]  }
  0x1f   :  { %232 = vmatpush3.bf16.msra.mxu0 %v248_v1  ;;  %v56_v5 = vpack.c.bf16 %v55_v4, %v54_v3  ;;  %v225_v6 = vld [vmem:[%s393_s2] ss:$0 sm:$0xff]  ;;  %s209_s16 = sshll.u32 %s328_s15, 4  ;;  %s210_s16 = int_to_ptr.vmem [resolvable:$true] %s209_s16 }
  0x20   :  { %233 = vmatprep.subr.bf16.mxu0 %v326_v0  ;;  %v226_v38 = vld [vmem:[%s395_s4] ss:$0 sm:$0xff]  ;;  %s294_s17 = scalar_lea.vmem %s210_s16, 256  ;;  %p299_p11 = scmp.lt.s32.totalorder %s210_s16, %s210_s16 }
  0x21   :  { %v227_v40 = vld [vmem:[%s396_s5] ss:$0 sm:$0xff]  ;;  %p295_p10 = scmp.ne.s32.totalorder %s210_s16, %s294_s17  ;;  %p300_p12 = scmp.lt.s32.totalorder %s294_s17, %s294_s17 }
  0x23   :  { %234 = vmatpush3.bf16.msra.mxu0 %v249_v2  ;;  %p301_p13 = por %p300_p12, %p299_p11 }
  0x25   :  { %p302_p0 = pnand %p301_p13, %p295_p10 }
  0x26   :  { %236 = vmatmul.mubr.msk.bf16.vlgmr.msra.gmra.mxu0 %vm73_vm1, %v56_v5 }
  0xe6   :  { %v111_v7 = vpop.f32.mrf.mxu0 }
  0xe7   :  { %v146_v9 = vadd.f32 %v225_v6, %v111_v7 }
  0xe8   :  { %v237_v10 = vpop.f32.mrf.mxu0 }
  0xe9   :  { %v152_v11 = vmul.f32 %v151_v8, %v146_v9  ;;  %vm149_vm2 = vcmp.ge.f32.partialorder %v146_v9, 0.0 }
  0xea   :  { %v114_v12 = vpop.f32.mrf.mxu0 }
  0xeb   :  { %v147_v13 = vadd.f32 %v225_v6, %v114_v12  ;;  %v154_v14 = vsel %vm149_vm2, %v146_v9, %v152_v11 }
  0xec   :  { %156 = vadd.xlane.f32.xlu0 %v154_v14  ;;  %v238_v15 = vpop.f32.mrf.mxu0  ;;  %v160_v16 = vmul.f32 %v154_v14, %v154_v14 }
  0xed   :  { %v153_v17 = vmul.f32 %v151_v8, %v147_v13  ;;  %vm150_vm3 = vcmp.ge.f32.partialorder %v147_v13, 0.0 }
  0xee   :  { %162 = vadd.xlane.f32.xlu1 %v160_v16 }
  0xef   :  { %v155_v18 = vsel %vm150_vm3, %v147_v13, %v153_v17 }
  0xf0   :  { %158 = vadd.xlane.f32.xlu0 %v155_v18  ;;  %v161_v19 = vmul.f32 %v155_v18, %v155_v18 }
  0xf2   :  { %164 = vadd.xlane.f32.xlu1 %v161_v19 }
 0x175   :  { %v157_v20 = vpop.xlane.xlu0 %156 }
 0x176   :  { %v166_v21 = vmul.f32 0.03125, %v157_v20 }
 0x177   :  { %v163_v22 = vpop.xlane.xlu1 %162 }
 0x178   :  { %v170_v23 = vmul.f32 %v166_v21, %v166_v21  ;;  %v168_v24 = vmul.f32 0.03125, %v163_v22  ;;  %v176_v36 = vsub.f32 %v154_v14, %v166_v21 }
 0x179   :  { %v159_v25 = vpop.xlane.xlu0 %158 }
 0x17a   :  { %v172_v26 = vsub.f32 %v168_v24, %v170_v23  ;;  %v167_v27 = vmul.f32 0.03125, %v159_v25 }
 0x17b   :  { %v165_v28 = vpop.xlane.xlu1 %164 }
 0x17c   :  { %v174_v29 = vmax.f32 %v172_v26, 0.0  ;;  %v171_v30 = vmul.f32 %v167_v27, %v167_v27  ;;  %v169_v31 = vmul.f32 0.03125, %v165_v28  ;;  %v177_v41 = vsub.f32 %v155_v18, %v167_v27 }
 0x17e   :  { %v178_v32 = vadd.f32 1e-05, %v174_v29  ;;  %v173_v33 = vsub.f32 %v169_v31, %v171_v30 }
 0x180   :  { %250 = vrsqrt.f32 %v178_v32  ;;  %v175_v34 = vmax.f32 %v173_v33, 0.0 }
 0x182   :  { %v179_v35 = vadd.f32 1e-05, %v175_v34 }
 0x184   :  { %252 = vrsqrt.f32 %v179_v35 }
 0x18d   :  { %v251_v37 = vpop.eup %250 }
 0x18e   :  { %v182_v39 = vmul.f32 %v251_v37, %v176_v36 }
 0x190   :  { %v191_v42 = vmul.f32 %v226_v38, %v182_v39 }
 0x191   :  { %v253_v43 = vpop.eup %252 }
 0x192   :  { %v183_v44 = vmul.f32 %v253_v43, %v177_v41  ;;  %v200_v45 = vadd.f32 %v227_v40, %v191_v42 }
 0x194   :  { %v192_v46 = vmul.f32 %v226_v38, %v183_v44  ;;  %202 = vst [vmem:[#allocation9] sm:$0xff] %v200_v45 }
 0x196   :  { %v201_v47 = vadd.f32 %v227_v40, %v192_v46 }
 0x198   :  { %203 = vst [vmem:[#allocation9 + $0x8] sm:$0xff] %v201_v47 }
 0x199   :  { %305 = shalt.err (!%p302_p0)
}
 0x19a   :  { %215 = dma.vmem_to_hbm [thread:$0]  %s210_s16, 256, %s397_s6, [#allocation6], %s321_s24, %s321_s24, %s322_s25  }
 0x19b   :  { %318 = dma.done.wait [#allocation6], 256  }
 0x19c   :  { %319 = vsyncadd [#allocation6], 4294967040 }
 0x19d   :  { %219 = vsyncpa [#allocation5], 1 }
 0x19e   :  { %220 = vsyncpa [#allocation8], 1 }
 0x19f   :  { %221 = vsyncpa [#allocation6], 1 }

</bundles_post_ra>
